<compile_context>
chip_gen: v6e
topology: v6e:2x2x1
jax: 0.10.0
libtpu: 0.0.40
codegen_flags: <defaults>
</compile_context>

<pallas_src>
import functools

import jax
import jax.numpy as jnp
from jax.experimental import pallas as pl
from jax.experimental.pallas import tpu as pltpu

IN_DIM = 28 * 28 * 1   # 784
HID = 28
OUT = 10
HID_PAD = 128          # hidden lanes padded to a full vreg width
LOGIT_PAD = 128        # fc2 lanes inside the kernel (full-lane log_softmax)
OUT_STORE = 16         # lanes actually written back to HBM (>= OUT)
NEG_BIG = -1e30        # padding bias so padded logits vanish in log-sum-exp


def _cdiv(a, b):
    return (a + b - 1) // b


def _round_up(n, m):
    return ((n + m - 1) // m) * m


def mnist_mlp_kernel(x_ref, w1_ref, b1_ref, w2_ref, b2_ref, o_ref):
    # x arrives f32; cast to bf16 in-VMEM (avoids a separate HBM pass over x).
    xb = x_ref[...].astype(jnp.bfloat16)

    # fc1: bf16 x bf16 -> f32 accumulate on MXU, bias + ReLU in f32 on VPU.
    h = jnp.dot(xb, w1_ref[...], preferred_element_type=jnp.float32)
    h = jnp.maximum(h + b1_ref[...], 0.0)              # (TB, 128); padded lanes stay 0

    # fc2: bf16 matmul, f32 accumulate. Padded b2 lanes are -1e30.
    logits = jnp.dot(h.astype(jnp.bfloat16), w2_ref[...],
                     preferred_element_type=jnp.float32)
    logits = logits + b2_ref[...]                      # (TB, 128)

    # Numerically stable log_softmax over 128 lanes == over the real 10 classes,
    # because padded lanes carry -1e30 and contribute exp(...) == 0.  All in f32.
    m = jnp.max(logits, axis=-1, keepdims=True)
    shifted = logits - m
    lse = jnp.log(jnp.sum(jnp.exp(shifted), axis=-1, keepdims=True))
    logp = shifted - lse

    # Only the first OUT_STORE (=16) lanes go back to HBM (8x less writeback).
    o_ref[...] = logp[:, :OUT_STORE].astype(o_ref.dtype)


def prepare_params(w1, b1, w2, b2):
    """One-time layout work: transpose to (in, out), pad to 128 lanes, cast."""
    w1_t = jnp.zeros((IN_DIM, HID_PAD), jnp.bfloat16)
    w1_t = w1_t.at[:, :HID].set(w1.T.astype(jnp.bfloat16))          # (784, 128)
    b1_p = jnp.zeros((1, HID_PAD), jnp.float32).at[:, :HID].set(b1.reshape(1, HID))
    w2_t = jnp.zeros((HID_PAD, LOGIT_PAD), jnp.bfloat16)
    w2_t = w2_t.at[:HID, :OUT].set(w2.T.astype(jnp.bfloat16))       # (128, 128)
    b2_p = jnp.full((1, LOGIT_PAD), NEG_BIG, jnp.float32)
    b2_p = b2_p.at[:, :OUT].set(b2.reshape(1, OUT))
    return w1_t, b1_p, w2_t, b2_p


@functools.partial(jax.jit, static_argnames=("max_block_b", "min_steps"))
def mnist_net_forward(x, params, max_block_b=2048, min_steps=2):
    """x: (B, 1, 28, 28) float32 (NCHW like PyTorch). Returns log-probs (B, 10) f32."""
    w1_t, b1_p, w2_t, b2_p = params
    B = x.shape[0]
    x2d = x.reshape(B, IN_DIM)     # stays f32; cast happens inside the kernel

    # Batch tile: big enough to hit the HBM roofline, split into >= min_steps grid
    # steps (when B allows) so the parallel axis feeds both v7x TensorCores and the
    # x DMA double-buffers.  Tiny batches use a single full-array block.
    if B < 8:
        block_b = B                                   # block == full array dim: legal
    else:
        block_b = min(max_block_b, max(8, _round_up(_cdiv(B, min_steps), 8)))
    grid = (_cdiv(B, block_b),)

    out = pl.pallas_call(
        mnist_mlp_kernel,
        out_shape=jax.ShapeDtypeStruct((B, OUT_STORE), jnp.float32),
        grid=grid,
        in_specs=[
            pl.BlockSpec((block_b, IN_DIM), lambda i: (i, 0)),      # x: streamed f32
            pl.BlockSpec((IN_DIM, HID_PAD), lambda i: (0, 0)),      # w1: resident bf16
            pl.BlockSpec((1, HID_PAD), lambda i: (0, 0)),           # b1: resident f32
            pl.BlockSpec((HID_PAD, LOGIT_PAD), lambda i: (0, 0)),   # w2: resident bf16
            pl.BlockSpec((1, LOGIT_PAD), lambda i: (0, 0)),         # b2: resident f32
        ],
        out_specs=pl.BlockSpec((block_b, OUT_STORE), lambda i: (i, 0)),
        compiler_params=pltpu.CompilerParams(
            dimension_semantics=("parallel",)),
    )(x2d, w1_t, b1_p, w2_t, b2_p)

    return out[:, :OUT]


def init_params(key):
    """Deterministic synthetic params with nn.Linear-style shapes/init."""
    k1, k2, k3, k4 = jax.random.split(key, 4)
    bound1 = 1.0 / jnp.sqrt(float(IN_DIM))
    bound2 = 1.0 / jnp.sqrt(float(HID))
    w1 = jax.random.uniform(k1, (HID, IN_DIM), jnp.float32, -bound1, bound1)
    b1 = jax.random.uniform(k2, (HID,), jnp.float32, -bound1, bound1)
    w2 = jax.random.uniform(k3, (OUT, HID), jnp.float32, -bound2, bound2)
    b2 = jax.random.uniform(k4, (OUT,), jnp.float32, -bound2, bound2)
    return w1, b1, w2, b2


def reference_forward(x, w1, b1, w2, b2):
    """Pure-JAX f32 reference matching the PyTorch module."""
    B = x.shape[0]
    h = jnp.maximum(x.reshape(B, IN_DIM) @ w1.T + b1, 0.0)
    logits = h @ w2.T + b2
    return jax.nn.log_softmax(logits, axis=-1)


if __name__ == "__main__":
    key = jax.random.PRNGKey(0)
    k_x, k_p = jax.random.split(key)

    B = 2
    x = jax.random.normal(k_x, (B, 1, 28, 28), jnp.float32)   # NCHW like PyTorch
    w1, b1, w2, b2 = init_params(k_p)
    params = prepare_params(w1, b1, w2, b2)

    out = mnist_net_forward(x, params)
    out = jax.block_until_ready(out)

    # sanity: shape, rows exponentiate-sum to 1, and match the f32 reference
    assert out.shape == (B, OUT)
    row_sums = jnp.exp(out).sum(axis=-1)
    assert jnp.allclose(row_sums, 1.0, atol=1e-5)
    ref = reference_forward(x, w1, b1, w2, b2)
    assert jnp.allclose(out, ref, atol=3e-2, rtol=3e-2), (
        float(jnp.max(jnp.abs(out - ref))))

    print("KERNEL_OK")
</pallas_src>

<mosaic_0001>
module attributes {stable_mosaic.version = 11 : i64} {
  func.func @mnist_mlp_kernel(%arg0: i32, %arg1: memref<2x784xf32, #tpu.memory_space<vmem>>, %arg2: memref<784x128xbf16, #tpu.memory_space<vmem>>, %arg3: memref<1x128xf32, #tpu.memory_space<vmem>>, %arg4: memref<128x128xbf16, #tpu.memory_space<vmem>>, %arg5: memref<1x128xf32, #tpu.memory_space<vmem>>, %arg6: memref<2x16xf32, #tpu.memory_space<vmem>>) attributes {dimension_semantics = [#tpu.dimension_semantics<parallel>], iteration_bounds = array<i64: 1>, scalar_prefetch = 0 : i64, scratch_operands = 0 : i64, tpu.core_type = #tpu.core_type<tc>, window_params = [{transform_indices = @transform_0, window_bounds = array<i64: 2, 784>}, {pipeline_mode = #tpu.pipeline_mode<synchronous>, transform_indices = @transform_1, window_bounds = array<i64: 784, 128>}, {pipeline_mode = #tpu.pipeline_mode<synchronous>, transform_indices = @transform_2, window_bounds = array<i64: 1, 128>}, {pipeline_mode = #tpu.pipeline_mode<synchronous>, transform_indices = @transform_3, window_bounds = array<i64: 128, 128>}, {pipeline_mode = #tpu.pipeline_mode<synchronous>, transform_indices = @transform_4, window_bounds = array<i64: 1, 128>}, {transform_indices = @transform_5, window_bounds = array<i64: 2, 16>}]} {
    %c0 = arith.constant 0 : index
    %c0_0 = arith.constant 0 : index
    %0 = vector.load %arg1[%c0, %c0_0] : memref<2x784xf32, #tpu.memory_space<vmem>>, vector<2x784xf32>
    %1 = arith.truncf %0 : vector<2x784xf32> to vector<2x784xbf16>
    %c0_1 = arith.constant 0 : index
    %c0_2 = arith.constant 0 : index
    %2 = vector.load %arg2[%c0_1, %c0_2] : memref<784x128xbf16, #tpu.memory_space<vmem>>, vector<784x128xbf16>
    %cst = arith.constant dense<0.000000e+00> : vector<2x128xf32>
    %3 = tpu.matmul %1, %2, %cst {dimension_numbers = #tpu.dot_dimension_numbers<[1], [0], [0], [1], [0, 0, 1, 1], [], []>} : vector<2x784xbf16>, vector<784x128xbf16>, vector<2x128xf32> -> vector<2x128xf32>
    %c0_3 = arith.constant 0 : index
    %c0_4 = arith.constant 0 : index
    %4 = vector.load %arg3[%c0_3, %c0_4] : memref<1x128xf32, #tpu.memory_space<vmem>>, vector<1x128xf32>
    %5 = vector.broadcast %4 : vector<1x128xf32> to vector<2x128xf32>
    %6 = arith.addf %3, %5 : vector<2x128xf32>
    %cst_5 = arith.constant 0.000000e+00 : f32
    %7 = vector.broadcast %cst_5 : f32 to vector<2x128xf32>
    %8 = arith.maximumf %6, %7 : vector<2x128xf32>
    %9 = arith.truncf %8 : vector<2x128xf32> to vector<2x128xbf16>
    %c0_6 = arith.constant 0 : index
    %c0_7 = arith.constant 0 : index
    %10 = vector.load %arg4[%c0_6, %c0_7] : memref<128x128xbf16, #tpu.memory_space<vmem>>, vector<128x128xbf16>
    %cst_8 = arith.constant dense<0.000000e+00> : vector<2x128xf32>
    %11 = tpu.matmul %9, %10, %cst_8 {dimension_numbers = #tpu.dot_dimension_numbers<[1], [0], [0], [1], [0, 0, 1, 1], [], []>} : vector<2x128xbf16>, vector<128x128xbf16>, vector<2x128xf32> -> vector<2x128xf32>
    %c0_9 = arith.constant 0 : index
    %c0_10 = arith.constant 0 : index
    %12 = vector.load %arg5[%c0_9, %c0_10] : memref<1x128xf32, #tpu.memory_space<vmem>>, vector<1x128xf32>
    %13 = vector.broadcast %12 : vector<1x128xf32> to vector<2x128xf32>
    %14 = arith.addf %11, %13 : vector<2x128xf32>
    %cst_11 = arith.constant dense<0xFF800000> : vector<2xf32>
    %15 = vector.multi_reduction <maximumf>, %14, %cst_11 [1] : vector<2x128xf32> to vector<2xf32>
    %16 = vector.shape_cast %15 : vector<2xf32> to vector<2x1xf32>
    %17 = vector.broadcast %16 : vector<2x1xf32> to vector<2x128xf32>
    %18 = arith.subf %14, %17 : vector<2x128xf32>
    %19 = math.exp %18 : vector<2x128xf32>
    %cst_12 = arith.constant dense<0.000000e+00> : vector<2xf32>
    %20 = vector.multi_reduction <add>, %19, %cst_12 [1] : vector<2x128xf32> to vector<2xf32>
    %21 = vector.shape_cast %20 : vector<2xf32> to vector<2x1xf32>
    %22 = math.log %21 : vector<2x1xf32>
    %23 = vector.broadcast %22 : vector<2x1xf32> to vector<2x128xf32>
    %24 = arith.subf %18, %23 : vector<2x128xf32>
    %25 = vector.extract_strided_slice %24 {offsets = [0, 0], sizes = [2, 16], strides = [1, 1]} : vector<2x128xf32> to vector<2x16xf32>
    %c0_13 = arith.constant 0 : index
    %c0_14 = arith.constant 0 : index
    %26 = vector.load %arg6[%c0_13, %c0_14] : memref<2x16xf32, #tpu.memory_space<vmem>>, vector<2x16xf32>
    tpu.vector_store %arg6[%c0_13, %c0_14], %25 {strides = array<i32>} : memref<2x16xf32, #tpu.memory_space<vmem>>, vector<2x16xf32>,
    return
  }
  func.func @transform_0(%arg0: i32) -> (i32, i32) {
    %c0_i32 = arith.constant 0 : i32
    %c0_i32_0 = arith.constant 0 : i32
    return %arg0, %c0_i32 : i32, i32
  }
  func.func @transform_1(%arg0: i32) -> (i32, i32) {
    %c0_i32 = arith.constant 0 : i32
    %c0_i32_0 = arith.constant 0 : i32
    %c0_i32_1 = arith.constant 0 : i32
    return %c0_i32, %c0_i32_0 : i32, i32
  }
  func.func @transform_2(%arg0: i32) -> (i32, i32) {
    %c0_i32 = arith.constant 0 : i32
    %c0_i32_0 = arith.constant 0 : i32
    %c0_i32_1 = arith.constant 0 : i32
    return %c0_i32, %c0_i32_0 : i32, i32
  }
  func.func @transform_3(%arg0: i32) -> (i32, i32) {
    %c0_i32 = arith.constant 0 : i32
    %c0_i32_0 = arith.constant 0 : i32
    %c0_i32_1 = arith.constant 0 : i32
    return %c0_i32, %c0_i32_0 : i32, i32
  }
  func.func @transform_4(%arg0: i32) -> (i32, i32) {
    %c0_i32 = arith.constant 0 : i32
    %c0_i32_0 = arith.constant 0 : i32
    %c0_i32_1 = arith.constant 0 : i32
    return %c0_i32, %c0_i32_0 : i32, i32
  }
  func.func @transform_5(%arg0: i32) -> (i32, i32) {
    %c0_i32 = arith.constant 0 : i32
    %c0_i32_0 = arith.constant 0 : i32
    return %arg0, %c0_i32 : i32, i32
  }
}

</mosaic_0001>

<bundles_post_ra>
// kernel: mnist_net_forward.1
= control target key start
LH: loop header
LB: loop body
LE: loop exit
PB: predicated region body
PF: predicated region fallthrough
CT: control target
= control target key end

     0   :  { %10 = vsyncpa [#allocation3], 0  ;;  %s1163_s0 = inlined_call_operand.vmem [shape: f32[2,784], index: 0, kind: input, shape index: {}]   ;;  %s1164_s1 = inlined_call_operand.hbm [shape: bf16[784,128], index: 1, kind: input, shape index: {}]   ;;  %s1165_s2 = inlined_call_operand.vmem [shape: f32[1,128], index: 2, kind: input, shape index: {}]   ;;  %s1166_s3 = inlined_call_operand.vmem [shape: bf16[128,128], index: 3, kind: input, shape index: {}]   ;;  %s1167_s4 = inlined_call_operand.vmem [shape: f32[1,128], index: 4, kind: input, shape index: {}]   ;;  %s1168_s5 = inlined_call_operand.hbm [shape: f32[2,16], index: 5, kind: output, shape index: {}]  }
   0x1   :  { %11 = vsyncpa [#allocation4], 0  ;;  %s1070_s18 = smov [#allocation2]  }
   0x2   :  { %s19_s19 = sshll.u32 %s1070_s18, 4  ;;  %s20_s19 = int_to_ptr.vmem [resolvable:$true] %s19_s19 }
   0x3   :  { %s1034_s20 = scalar_lea.vmem %s20_s19, 6272  ;;  %p1039_p1 = scmp.lt.s32.totalorder %s20_s19, %s20_s19 }
   0x4   :  { %p1035_p0 = scmp.ne.s32.totalorder %s20_s19, %s1034_s20  ;;  %p1040_p2 = scmp.lt.s32.totalorder %s1034_s20, %s1034_s20 }
   0x6   :  { %p1041_p3 = por %p1040_p2, %p1039_p1 }
   0x8   :  { %p1042_p4 = pnand %p1041_p3, %p1035_p0 }
   0xa   :  { %1045 = shalt.err (!%p1042_p4)
}
   0xb   :  { %s1071_s21 = smov 64   ;;  %s1072_s22 = smov 4  }
   0xc   :  { %25 = dma.hbm_to_vmem [thread:$0]  %s1164_s1, 6272, %s20_s19, [#allocation3], %s1071_s21, %s1071_s21, %s1072_s22  }
   0xd   :  { %1066 = dma.done.wait [#allocation3], 6272  }
   0xe   :  { %1067 = vsyncadd [#allocation3], 4294961024  ;;  %v963_v0 = vld [vmem:[#allocation2 + $0x78] sm:$0xff]   ;;  %v967_v4 = vld [vmem:[#allocation2 + $0x70] sm:$0xff]   ;;  %v1073_v21 = vmov 1983009808   ;;  %v44_v23 = vlaneseq }
   0xf   :  { %v964_v1 = vld [vmem:[#allocation2 + $0x38] sm:$0xff]   ;;  %853 = vmatprep.subr.bf16.mxu0 %v963_v0  ;;  %v968_v5 = vld [vmem:[#allocation2 + $0x30] sm:$0xff]   ;;  %v971_v8 = vld [vmem:[#allocation2 + $0x68] sm:$0xff]   ;;  %v42_v22 = vunpack.c.l.s4 %v1073_v21  ;;  %v1074_v45 = vmov 0.0   ;;  %vm1075_vm0 = vmmov 0   ;;  %vm486_vm1 = vcmask 130048  }
  0x10   :  { %v965_v2 = vld [vmem:[#allocation2 + $0xf8] sm:$0xff]   ;;  %854 = vmatpush3.bf16.msra.mxu0 %v964_v1  ;;  %v969_v6 = vld [vmem:[#allocation2 + $0xf0] sm:$0xff]   ;;  %v972_v9 = vld [vmem:[#allocation2 + $0x28] sm:$0xff]   ;;  %v45_v29 = vshrl.u32 %v44_v23, 7  ;;  %vm763_vm2 = vcmask 1041408   ;;  %vm776_vm3 = vcmask 123904  }
  0x11   :  { %v966_v3 = vld [vmem:[#allocation2 + $0xb8] sm:$0xff]   ;;  %875 = vmatprep.subr.bf16.mxu1 %v965_v2  ;;  %855 = vmatprep.subr.bf16.mxu0 %v967_v4  ;;  %v970_v7 = vld [vmem:[#allocation2 + $0xb0] sm:$0xff]   ;;  %v973_v10 = vld [vmem:[#allocation2 + $0xe8] sm:$0xff]   ;;  %v43_v28 = vunpack.c.0.s8 %v42_v22 }
  0x12   :  { %876 = vmatpush3.bf16.msra.mxu1 %v966_v3  ;;  %v974_v11 = vld [vmem:[#allocation2 + $0xa8] sm:$0xff]   ;;  %v975_v12 = vld [vmem:[#allocation2 + $0x60] sm:$0xff]   ;;  %v979_v16 = vld [vmem:[#allocation2 + $0x58] sm:$0xff]  }
  0x13   :  { %877 = vmatprep.subr.bf16.mxu1 %v969_v6  ;;  %v976_v13 = vld [vmem:[#allocation2 + $0x20] sm:$0xff]   ;;  %v980_v17 = vld [vmem:[#allocation2 + $0x18] sm:$0xff]   ;;  %v983_v20 = vld [vmem:[#allocation2 + $0x50] sm:$0xff]   ;;  %v46_v34 = vsub.s32 %v43_v28, %v45_v29 }
  0x14   :  { %856 = vmatpush3.bf16.msra.mxu0 %v968_v5  ;;  %v977_v14 = vld [vmem:[#allocation2 + $0xe0] sm:$0xff]   ;;  %v981_v18 = vld [vmem:[#allocation2 + $0xd8] sm:$0xff]   ;;  %v984_v24 = vld [vmem:[#allocation2 + $0x10] sm:$0xff]  }
  0x15   :  { %857 = vmatprep.subr.bf16.mxu0 %v971_v8  ;;  %v978_v15 = vld [vmem:[#allocation2 + $0xa0] sm:$0xff]   ;;  %v982_v19 = vld [vmem:[#allocation2 + $0x98] sm:$0xff]   ;;  %v985_v25 = vld [vmem:[#allocation2 + $0xd0] sm:$0xff]  }
  0x16   :  { %878 = vmatpush3.bf16.msra.mxu1 %v970_v7  ;;  %v986_v26 = vld [vmem:[#allocation2 + $0x90] sm:$0xff]   ;;  %v987_v27 = vld [vmem:[#allocation2 + $0x48] sm:$0xff]   ;;  %v991_v33 = vld [vmem:[#allocation2 + $0x40] sm:$0xff]  }
  0x17   :  { %879 = vmatprep.subr.bf16.mxu1 %v973_v10  ;;  %v988_v30 = vld [vmem:[#allocation2 + $0x8] sm:$0xff]   ;;  %v992_v35 = vld [vmem:[#allocation2] sm:$0xff]   ;;  %v995_v41 = vld [vmem:[#allocation2 + $0x178] sm:$0xff]  }
  0x18   :  { %858 = vmatpush3.bf16.msra.mxu0 %v972_v9  ;;  %v989_v31 = vld [vmem:[#allocation2 + $0xc8] sm:$0xff]   ;;  %v993_v36 = vld [vmem:[#allocation2 + $0xc0] sm:$0xff]   ;;  %v997_v48 = vld [vmem:[#allocation2 + $0x138] sm:$0xff]  }
  0x19   :  { %859 = vmatprep.subr.bf16.mxu0 %v975_v12  ;;  %v990_v32 = vld [vmem:[#allocation2 + $0x88] sm:$0xff]   ;;  %v36_v37 = vld [vmem:[%s1163_s0] sm:$0xff]  ;;  %v998_v50 = vld [vmem:[#allocation2 + $0x170] sm:$0xff]  }
  0x1a   :  { %880 = vmatpush3.bf16.msra.mxu1 %v974_v11  ;;  %v47_v38 = vrot.slane %v36_v37, %v46_v34  ;;  %v994_v39 = vld [vmem:[#allocation2 + $0x80] sm:$0xff]   ;;  %v40_v40 = vcombine.high %v36_v37, %v36_v37  ;;  %v999_v52 = vld [vmem:[#allocation2 + $0x130] sm:$0xff]   ;;  %v1000_v53 = vld [vmem:[#allocation2 + $0x168] sm:$0xff]  }
  0x1b   :  { %881 = vmatprep.subr.bf16.mxu1 %v977_v14  ;;  %v1001_v54 = vld [vmem:[#allocation2 + $0x128] sm:$0xff]   ;;  %v1002_v55 = vld [vmem:[#allocation2 + $0x160] sm:$0xff]   ;;  %v1004_v57 = vld [vmem:[#allocation2 + $0x158] sm:$0xff]  }
  0x1c   :  { %860 = vmatpush3.bf16.msra.mxu0 %v976_v13  ;;  %v55_v42 = vcombine.high %v47_v38, %v47_v38  ;;  %v54_v43 = vrot.slane %v40_v40, %v46_v34  ;;  %v80_v44 = vpack.c.bf16 %v47_v38, %v47_v38  ;;  %v1003_v56 = vld [vmem:[#allocation2 + $0x120] sm:$0xff]   ;;  %v37_v59 = vld [vmem:[%s1163_s0 + $0x8] sm:$0x3f]  ;;  %v1005_v60 = vld [vmem:[#allocation2 + $0x118] sm:$0xff]  }
  0x1d   :  { %861 = vmatprep.subr.bf16.mxu0 %v979_v16  ;;  %v1012_v58 = vld [vmem:[#allocation2 + $0x180] sm:$0xff]   ;;  %v57_v61 = vcombine.high %v37_v59, %v37_v59  ;;  %v64_v62 = vrot.slane %v37_v59, %v46_v34  ;;  %v1006_v63 = vld [vmem:[#allocation2 + $0x150] sm:$0xff]   ;;  %v1008_v5 = vld [vmem:[#allocation2 + $0x148] sm:$0xff]  }
  0x1e   :  { %882 = vmatpush3.bf16.msra.mxu1 %v978_v15  ;;  %v81_v46 = vpack.c.bf16 %v55_v42, %v55_v42  ;;  %v56_v47 = vcombine.high %v54_v43, %v54_v43  ;;  %v82_v49 = vpack.c.bf16 %v54_v43, %v54_v43  ;;  %v1007_v4 = vld [vmem:[#allocation2 + $0x110] sm:$0xff]   ;;  %v1009_v6 = vld [vmem:[#allocation2 + $0x108] sm:$0xff]   ;;  %v1010_v7 = vld [vmem:[#allocation2 + $0x140] sm:$0xff]  }
  0x1f   :  { %883 = vmatprep.subr.bf16.mxu1 %v981_v18  ;;  %v71_v0 = vrot.slane %v57_v61, %v46_v34  ;;  %v72_v1 = vcombine.high %v64_v62, %v64_v62  ;;  %v1011_v8 = vld [vmem:[#allocation2 + $0x100] sm:$0xff]   ;;  %v84_v9 = vpack.c.bf16 %v64_v62, %v64_v62  ;;  %v1014_v10 = vld [vmem:[%s1166_s3 + $0x38] sm:$0xff]   ;;  %v1015_v11 = vld [vmem:[%s1166_s3 + $0x30] sm:$0xff]  }
  0x20   :  { %862 = vmatpush3.bf16.msra.mxu0 %v980_v17  ;;  %522 = vmatprep.mubr.bf16.mxu0 %v81_v46  ;;  %v83_v51 = vpack.c.bf16 %v56_v47, %v56_v47  ;;  %v1016_v12 = vld [vmem:[%s1166_s3 + $0x28] sm:$0xff]   ;;  %v1017_v13 = vld [vmem:[%s1166_s3 + $0x20] sm:$0xff]   ;;  %v1018_v14 = vld [vmem:[%s1166_s3 + $0x18] sm:$0xff]  }
  0x21   :  { %863 = vmatprep.subr.bf16.mxu0 %v983_v20  ;;  %v85_v2 = vpack.c.bf16 %v72_v1, %v72_v1  ;;  %v86_v3 = vpack.c.bf16 %v71_v0, %v71_v0  ;;  %v1019_v15 = vld [vmem:[%s1166_s3 + $0x10] sm:$0xff]   ;;  %v1020_v16 = vld [vmem:[%s1166_s3 + $0x8] sm:$0xff]   ;;  %v1021_v17 = vld [vmem:[%s1166_s3] sm:$0xff]  }
  0x22   :  { %884 = vmatpush3.bf16.msra.mxu1 %v982_v19  ;;  %562 = vmatprep.mubr.bf16.mxu1 %v83_v51 }
  0x23   :  { %885 = vmatprep.subr.bf16.mxu1 %v985_v25 }
  0x24   :  { %864 = vmatpush3.bf16.msra.mxu0 %v984_v24 }
  0x25   :  { %865 = vmatprep.subr.bf16.mxu0 %v987_v27 }
  0x26   :  { %886 = vmatpush3.bf16.msra.mxu1 %v986_v26 }
  0x27   :  { %887 = vmatprep.subr.bf16.mxu1 %v989_v31  ;;  %v793_v31 = vld [vmem:[%s1165_s2] ss:$0 sm:$0xff]  ;;  %s1076_s2 = smov [#allocation5]  }
  0x28   :  { %866 = vmatpush3.bf16.msra.mxu0 %v988_v30 }
  0x29   :  { %867 = vmatprep.subr.bf16.mxu0 %v991_v33 }
  0x2a   :  { %888 = vmatpush3.bf16.msra.mxu1 %v990_v32 }
  0x2b   :  { %889 = vmatprep.subr.bf16.mxu1 %v993_v36 }
  0x2c   :  { %868 = vmatpush3.bf16.msra.mxu0 %v992_v35 }
  0x2d   :  { %897 = vmatprep.subr.bf16.mxu0 %v995_v41 }
  0x2e   :  { %890 = vmatpush3.bf16.msra.mxu1 %v994_v39 }
  0x2f   :  { %930 = vmatprep.subr.bf16.mxu1 %v1074_v45  ;;  %523 = vmatmul.mubr.bf16.vlgmr.msra.gmra.mxu0 %v80_v44  ;;  %v844_v44 = vld [vmem:[%s1167_s4] ss:$0 sm:$0xff]  ;;  %s784_s4 = sshll.u32 %s1076_s2, 4  ;;  %s785_s4 = int_to_ptr.vmem [resolvable:$true] %s784_s4 }
  0x30   :  { %898 = vmatpush3.bf16.msra.mxu0 %v997_v48  ;;  %602 = vmatprep.mubr.bf16.mxu0 %v85_v2  ;;  %s1046_s21 = scalar_lea.vmem %s785_s4, 32  ;;  %p1051_p6 = scmp.lt.s32.totalorder %s785_s4, %s785_s4 }
  0x31   :  { %563 = vmatmul.mubr.bf16.vlgmr.msra.gmra.mxu1 %v82_v49  ;;  %899 = vmatprep.subr.bf16.mxu0 %v998_v50  ;;  %p1047_p5 = scmp.ne.s32.totalorder %s785_s4, %s1046_s21  ;;  %p1052_p7 = scmp.lt.s32.totalorder %s1046_s21, %s1046_s21 }
  0x32   :  { %932 = vmatprep.mubr.msk.bf16.mxu1 %vm1075_vm0, %v1074_v45  ;;  %931 = vmatpush3.bf16.msra.mxu1 %v1012_v58 }
  0x33   :  { %936 = vmatprep.subr.bf16.mxu1 %v1074_v45  ;;  %p1053_p8 = por %p1052_p7, %p1051_p6 }
  0x34   :  { %900 = vmatpush3.bf16.msra.mxu0 %v999_v52 }
  0x35   :  { %901 = vmatprep.subr.bf16.mxu0 %v1000_v53  ;;  %p1054_p9 = pnand %p1053_p8, %p1047_p5 }
  0x38   :  { %902 = vmatpush3.bf16.msra.mxu0 %v1001_v54 }
  0x39   :  { %903 = vmatprep.subr.bf16.mxu0 %v1002_v55  ;;  %933 = vmatmul.mubr.msk.bf16.vlgmr.msra.gmra.mxu1 %vm486_vm1, %v86_v3 }
  0x3a   :  { %952 = vmatprep.mubr.msk.bf16.mxu1 %vm1075_vm0, %v1074_v45  ;;  %937 = vmatpush3.bf16.msra.mxu1 %v1014_v10 }
  0x3b   :  { %938 = vmatprep.subr.bf16.mxu1 %v1074_v45 }
  0x3c   :  { %904 = vmatpush3.bf16.msra.mxu0 %v1003_v56 }
  0x3d   :  { %905 = vmatprep.subr.bf16.mxu0 %v1004_v57 }
  0x3e   :  { %939 = vmatpush3.bf16.msra.mxu1 %v1015_v11 }
  0x3f   :  { %940 = vmatprep.subr.bf16.mxu1 %v1074_v45 }
  0x40   :  { %906 = vmatpush3.bf16.msra.mxu0 %v1005_v60 }
  0x41   :  { %907 = vmatprep.subr.bf16.mxu0 %v1006_v63 }
  0x42   :  { %941 = vmatpush3.bf16.msra.mxu1 %v1016_v12 }
  0x43   :  { %942 = vmatprep.subr.bf16.mxu1 %v1074_v45 }
  0x44   :  { %908 = vmatpush3.bf16.msra.mxu0 %v1007_v4 }
  0x45   :  { %909 = vmatprep.subr.bf16.mxu0 %v1008_v5 }
  0x46   :  { %943 = vmatpush3.bf16.msra.mxu1 %v1017_v13 }
  0x47   :  { %944 = vmatprep.subr.bf16.mxu1 %v1074_v45 }
  0x48   :  { %910 = vmatpush3.bf16.msra.mxu0 %v1009_v6 }
  0x49   :  { %911 = vmatprep.subr.bf16.mxu0 %v1010_v7 }
  0x4a   :  { %945 = vmatpush3.bf16.msra.mxu1 %v1018_v14 }
  0x4b   :  { %946 = vmatprep.subr.bf16.mxu1 %v1074_v45 }
  0x4c   :  { %912 = vmatpush3.bf16.msra.mxu0 %v1011_v8 }
  0x4e   :  { %947 = vmatpush3.bf16.msra.mxu1 %v1019_v15 }
  0x4f   :  { %603 = vmatmul.mubr.bf16.vlgmr.msra.gmra.mxu0 %v84_v9  ;;  %948 = vmatprep.subr.bf16.mxu1 %v1074_v45 }
  0x52   :  { %949 = vmatpush3.bf16.msra.mxu1 %v1020_v16 }
  0x53   :  { %950 = vmatprep.subr.bf16.mxu1 %v1074_v45 }
  0x56   :  { %951 = vmatpush3.bf16.msra.mxu1 %v1021_v17 }
  0xef   :  { %v869_v18 = vpop.f32.mrf.mxu0 }
  0xf1   :  { %v870_v19 = vpop.f32.mrf.mxu0  ;;  %v891_v20 = vpop.f32.mrf.mxu1 }
  0xf2   :  { %v871_v30 = vadd.f32 %v870_v19, %v869_v18 }
  0xf3   :  { %v872_v21 = vpop.f32.mrf.mxu0  ;;  %v892_v22 = vpop.f32.mrf.mxu1 }
  0xf4   :  { %v525_v32 = vadd.f32 %v871_v30, %v793_v31  ;;  %v893_v33 = vadd.f32 %v892_v22, %v891_v20 }
  0xf5   :  { %v873_v23 = vpop.f32.mrf.mxu0  ;;  %v894_v24 = vpop.f32.mrf.mxu1 }
  0xf6   :  { %v565_v36 = vadd.f32 %v893_v33, %v525_v32 }
  0xf7   :  { %v895_v25 = vpop.f32.mrf.mxu1 }
  0xf9   :  { %v644_v26 = vpop.f32.mrf.mxu1 }
  0xfb   :  { %v934_v27 = vpop.f32.mrf.mxu1 }
  0xfd   :  { %v647_v28 = vpop.f32.mrf.mxu1 }
  0xff   :  { %v935_v29 = vpop.f32.mrf.mxu1 }
 0x10f   :  { %v913_v34 = vpop.f32.mrf.mxu0 }
 0x111   :  { %v914_v35 = vpop.f32.mrf.mxu0 }
 0x112   :  { %v915_v37 = vadd.f32 %v914_v35, %v913_v34 }
 0x113   :  { %v916_v38 = vpop.f32.mrf.mxu0 }
 0x114   :  { %v605_v39 = vadd.f32 %v915_v37, %v565_v36 }
 0x115   :  { %v917_v40 = vpop.f32.mrf.mxu0 }
 0x116   :  { %v645_v41 = vadd.f32 %v644_v26, %v605_v39 }
 0x118   :  { %v650_v42 = vmax.f32 %v645_v41, 0.0 }
 0x11a   :  { %v651_v43 = vpack.c.bf16 %v650_v42, %v650_v42 }
 0x11c   :  { %953 = vmatmul.mubr.bf16.vlgmr.msra.gmra.mxu1 %v651_v43 }
 0x1dc   :  { %v757_v45 = vpop.f32.mrf.mxu1 }
 0x1dd   :  { %v758_v46 = vadd.f32 %v844_v44, %v757_v45 }
 0x1de   :  { %v954_v47 = vpop.f32.mrf.mxu1 }
 0x1df   :  { %v764_v48 = vsel %vm763_vm2, %v758_v46, -inf }
 0x1e0   :  { %765 = vmax.xlane.f32.xlu0 %v764_v48  ;;  %v760_v49 = vpop.f32.mrf.mxu1 }
 0x1e2   :  { %v955_v50 = vpop.f32.mrf.mxu1 }
 0x269   :  { %v766_v51 = vpop.xlane.xlu0 %765 }
 0x26a   :  { %v767_v52 = vsub.f32 %v758_v46, %v766_v51 }
 0x26c   :  { %v768_v53 = vmul.f32 1.442695, %v767_v52 }
 0x26e   :  { %1022 = vpow2.f32 %v768_v53 }
 0x27b   :  { %v1023_v54 = vpop.eup %1022 }
 0x27c   :  { %v770_v55 = vsel %vm763_vm2, %v1023_v54, 0.0 }
 0x27d   :  { %771 = vadd.xlane.f32.xlu0 %v770_v55 }
 0x306   :  { %v772_v56 = vpop.xlane.xlu0 %771 }
 0x307   :  { %1024 = vlog2.f32 %v772_v56 }
 0x314   :  { %v1025_v57 = vpop.eup %1024 }
 0x315   :  { %v774_v58 = vmul.f32 0.6931472, %v1025_v57 }
 0x317   :  { %v775_v59 = vsub.f32 %v767_v52, %v774_v58 }
 0x319   :  { %777 = vst.msk [vmem:[#allocation5] sm:$0x3] %vm776_vm3, %v775_v59 }
 0x31a   :  { %1057 = shalt.err (!%p1054_p9)
}
 0x31b   :  { %787 = dma.vmem_to_hbm [thread:$0]  %s785_s4, 32, %s1168_s5, [#allocation4]  }
 0x31c   :  { %1068 = dma.done.wait [#allocation4], 32  }
 0x31d   :  { %1069 = vsyncadd [#allocation4], 4294967264 }
 0x31e   :  { %791 = vsyncpa [#allocation3], 1 }
 0x31f   :  { %792 = vsyncpa [#allocation4], 1 }

</bundles_post_ra>
